<compile_context>
chip_gen: v5e
topology: v5e:2x2
jax: 0.10.0
libtpu: 0.0.40
codegen_flags: <defaults>
</compile_context>

<pallas_src>
import numpy as np
import jax
import jax.numpy as jnp
from jax.experimental import pallas as pl
from jax.experimental.pallas import tpu as pltpu


def _interp_matrix(out_size: int, in_size: int) -> np.ndarray:
    """Linear-interp matrix M (out_size, in_size) matching F.grid_sample with a
    linspace(-1, 1, out_size) grid, align_corners=False, padding_mode='zeros'."""
    g = np.linspace(-1.0, 1.0, num=out_size)
    ix = ((g + 1.0) * in_size - 1.0) / 2.0            # unnormalize (align_corners=False)
    ix0 = np.floor(ix).astype(np.int64)
    ix1 = ix0 + 1
    w1 = ix - ix0
    w0 = 1.0 - w1
    M = np.zeros((out_size, in_size), dtype=np.float32)
    for i in range(out_size):
        if 0 <= ix0[i] < in_size:                     # zero padding: drop OOB taps
            M[i, ix0[i]] += w0[i]
        if 0 <= ix1[i] < in_size:
            M[i, ix1[i]] += w1[i]
    return M


def _pick_block_channels(nc: int, d: int, od: int, max_b: int = 16) -> int:
    """Pick how many (n, c) volumes to process per grid step.

    Constraints: divides NC; keeps the block's sublane dims (B*D, B*OD) 8-aligned
    (or block == full array); prefers >= 2 grid steps so both v7x TensorCores work.
    """
    cands = [
        b for b in range(1, nc + 1)
        if nc % b == 0 and b <= max_b
        and (b == nc or ((b * d) % 8 == 0 and (b * od) % 8 == 0))
    ]
    if not cands:
        return nc                      # single step, block == full array (always legal)
    two_step = [b for b in cands if nc // b >= 2]
    return max(two_step) if two_step else max(cands)


def _interp3d_kernel(x_ref, mhw_t_ref, md_blk_ref, o_ref):
    # x_ref:      (B*D,  H*W)    input block, B channels folded into M
    # mhw_t_ref:  (H*W,  OH*OW)  kron(MH, MW)^T    (H and W contractions fused)
    # md_blk_ref: (B*OD, B*D)    kron(I_B, MD)     (D contraction, B folded into M)
    # o_ref:      (B*OD, OH*OW)  lane-dense output block
    t = jnp.dot(x_ref[...], mhw_t_ref[...], preferred_element_type=jnp.float32)
    out = jnp.dot(md_blk_ref[...], t, preferred_element_type=jnp.float32)
    o_ref[...] = out.astype(o_ref.dtype)


def interpolate3d(x: jax.Array, od: int, oh: int, ow: int,
                  block_channels: int | None = None) -> jax.Array:
    """x: (N, C, D, H, W) float32 -> (N, C, od, oh, ow)."""
    N, C, D, H, W = x.shape
    nc = N * C

    md = _interp_matrix(od, D)                               # (OD, D)
    mh = _interp_matrix(oh, H)                               # (OH, H)
    mw = _interp_matrix(ow, W)                               # (OW, W)

    B = block_channels if block_channels is not None else _pick_block_channels(nc, D, od)
    assert nc % B == 0
    grid = (nc // B,)

    # Fused H/W interpolation operator and block-diagonal D operator (host-side, tiny).
    mhw_t = jnp.asarray(np.kron(mh, mw).T)                              # (H*W, OH*OW)
    md_blk = jnp.asarray(np.kron(np.eye(B, dtype=np.float32), md))      # (B*OD, B*D)

    # Contiguous metadata reshapes in HBM (free); the kernel never reshapes.
    xf = x.reshape(nc * D, H * W)

    itemsize = jnp.dtype(x.dtype).itemsize
    in_blk_bytes = B * D * H * W * itemsize
    out_blk_bytes = B * od * oh * ow * itemsize
    const_bytes = (mhw_t.size + md_blk.size) * 4
    vmem_limit = max(2 * (in_blk_bytes + out_blk_bytes) + const_bytes + (1 << 20),
                     16 << 20)

    flops = (2 * nc * D * (H * W) * (oh * ow)          # fused H/W contraction
             + 2 * nc * od * (B * D) * (oh * ow))      # block-diagonal D contraction
    bytes_accessed = (xf.size * itemsize
                      + nc * od * oh * ow * itemsize
                      + const_bytes)

    out2d = pl.pallas_call(
        _interp3d_kernel,
        out_shape=jax.ShapeDtypeStruct((nc * od, oh * ow), x.dtype),
        grid=grid,
        in_specs=[
            pl.BlockSpec((B * D, H * W), lambda i: (i, 0)),
            pl.BlockSpec((H * W, oh * ow), lambda i: (0, 0)),
            pl.BlockSpec((B * od, B * D), lambda i: (0, 0)),
        ],
        out_specs=pl.BlockSpec((B * od, oh * ow), lambda i: (i, 0)),
        compiler_params=pltpu.CompilerParams(
            dimension_semantics=("parallel",),
            vmem_limit_bytes=int(vmem_limit),
        ),
        cost_estimate=pl.CostEstimate(
            flops=int(flops),
            transcendentals=0,
            bytes_accessed=int(bytes_accessed),
        ),
    )(xf, mhw_t, md_blk)

    return out2d.reshape(N, C, od, oh, ow)


if __name__ == "__main__":
    # Small shapes consistent with the module: 5D input, output size (od, oh, ow).
    N, C, D, H, W = 2, 4, 8, 8, 8
    OD, OH, OW = 16, 16, 16

    key = jax.random.PRNGKey(0)
    x = jax.random.normal(key, (N, C, D, H, W), dtype=jnp.float32)

    y = interpolate3d(x, OD, OH, OW)
    y = jax.block_until_ready(y)
    assert y.shape == (N, C, OD, OH, OW)

    # Pure-JAX reference (same separable interpolation matrices == grid_sample).
    md = jnp.asarray(_interp_matrix(OD, D))
    mh = jnp.asarray(_interp_matrix(OH, H))
    mw = jnp.asarray(_interp_matrix(OW, W))
    ref = jnp.einsum("Zz,Yy,Xx,nczyx->ncZYX", md, mh, mw, x)
    np.testing.assert_allclose(np.asarray(y), np.asarray(ref), rtol=1e-5, atol=1e-5)

    print("KERNEL_OK")
</pallas_src>

<mosaic_0001>
module attributes {stable_mosaic.version = 11 : i64} {
  func.func @_interp3d_kernel(%arg0: i32, %arg1: memref<32x64xf32, #tpu.memory_space<vmem>>, %arg2: memref<64x256xf32, #tpu.memory_space<vmem>>, %arg3: memref<64x32xf32, #tpu.memory_space<vmem>>, %arg4: memref<64x256xf32, #tpu.memory_space<vmem>>) attributes {dimension_semantics = [#tpu.dimension_semantics<parallel>], iteration_bounds = array<i64: 2>, scalar_prefetch = 0 : i64, scratch_operands = 0 : i64, tpu.core_type = #tpu.core_type<tc>, window_params = [{transform_indices = @transform_0, window_bounds = array<i64: 32, 64>}, {pipeline_mode = #tpu.pipeline_mode<synchronous>, transform_indices = @transform_1, window_bounds = array<i64: 64, 256>}, {pipeline_mode = #tpu.pipeline_mode<synchronous>, transform_indices = @transform_2, window_bounds = array<i64: 64, 32>}, {transform_indices = @transform_3, window_bounds = array<i64: 64, 256>}]} {
    %c0 = arith.constant 0 : index
    %c0_0 = arith.constant 0 : index
    %0 = vector.load %arg1[%c0, %c0_0] : memref<32x64xf32, #tpu.memory_space<vmem>>, vector<32x64xf32>
    %c0_1 = arith.constant 0 : index
    %c0_2 = arith.constant 0 : index
    %1 = vector.load %arg2[%c0_1, %c0_2] : memref<64x256xf32, #tpu.memory_space<vmem>>, vector<64x256xf32>
    %cst = arith.constant dense<0.000000e+00> : vector<32x256xf32>
    %2 = tpu.matmul %0, %1, %cst {dimension_numbers = #tpu.dot_dimension_numbers<[1], [0], [0], [1], [0, 0, 1, 1], [], []>} : vector<32x64xf32>, vector<64x256xf32>, vector<32x256xf32> -> vector<32x256xf32>
    %c0_3 = arith.constant 0 : index
    %c0_4 = arith.constant 0 : index
    %3 = vector.load %arg3[%c0_3, %c0_4] : memref<64x32xf32, #tpu.memory_space<vmem>>, vector<64x32xf32>
    %cst_5 = arith.constant dense<0.000000e+00> : vector<64x256xf32>
    %4 = tpu.matmul %3, %2, %cst_5 {dimension_numbers = #tpu.dot_dimension_numbers<[1], [0], [0], [1], [0, 0, 1, 1], [], []>} : vector<64x32xf32>, vector<32x256xf32>, vector<64x256xf32> -> vector<64x256xf32>
    %c0_6 = arith.constant 0 : index
    %c0_7 = arith.constant 0 : index
    %5 = vector.load %arg4[%c0_6, %c0_7] : memref<64x256xf32, #tpu.memory_space<vmem>>, vector<64x256xf32>
    tpu.vector_store %arg4[%c0_6, %c0_7], %4 {strides = array<i32>} : memref<64x256xf32, #tpu.memory_space<vmem>>, vector<64x256xf32>,
    return
  }
  func.func @transform_0(%arg0: i32) -> (i32, i32) {
    %c0_i32 = arith.constant 0 : i32
    %c0_i32_0 = arith.constant 0 : i32
    return %arg0, %c0_i32 : i32, i32
  }
  func.func @transform_1(%arg0: i32) -> (i32, i32) {
    %c0_i32 = arith.constant 0 : i32
    %c0_i32_0 = arith.constant 0 : i32
    %c0_i32_1 = arith.constant 0 : i32
    return %c0_i32, %c0_i32_0 : i32, i32
  }
  func.func @transform_2(%arg0: i32) -> (i32, i32) {
    %c0_i32 = arith.constant 0 : i32
    %c0_i32_0 = arith.constant 0 : i32
    %c0_i32_1 = arith.constant 0 : i32
    return %c0_i32, %c0_i32_0 : i32, i32
  }
  func.func @transform_3(%arg0: i32) -> (i32, i32) {
    %c0_i32 = arith.constant 0 : i32
    %c0_i32_0 = arith.constant 0 : i32
    return %arg0, %c0_i32 : i32, i32
  }
}

</mosaic_0001>

<bundles_post_ra>
// kernel: tpu_custom_call.1
= control target key start
LH: loop header
LB: loop body
LE: loop exit
PB: predicated region body
PF: predicated region fallthrough
CT: control target
= control target key end

     0   :  { %8 = vsyncpa [#allocation3], 0  ;;  %s885_s0 = inlined_call_operand.vmem [shape: f32[64,64], index: 0, kind: input, shape index: {}]   ;;  %s886_s1 = inlined_call_operand.hbm [shape: f32[64,256], index: 1, kind: input, shape index: {}]   ;;  %s887_s2 = inlined_call_operand.vmem [shape: f32[64,32], index: 2, kind: input, shape index: {}]   ;;  %s888_s3 = inlined_call_operand.hbm [shape: f32[128,256], index: 3, kind: output, shape index: {}]  }
   0x1   :  { %9 = vsyncpa [#allocation4], 0 }
   0x2   :  { %11 = vsyncpa [#allocation4 + $0x1], 0  ;;  %s728_s12 = smov 0   ;;  %s730_s13 = smov 0  }
   0x3   :  { %s732_s14 = smov 0   ;;  %s734_s15 = smov 0  }
   0x4 LB: > { %s749_s16 = sadd.s32 4294967295, %s701_s15   ;;  %s502_s17 = sadd.s32 4294967294, %s701_s15   ;;  %s701_s15 = sphi %s734_s15, %s894_s15   ;;  %s697_s14 = sphi %s732_s14, %s893_s14   ;;  %s693_s13 = sphi %s730_s13, %s892_s13   ;;  %s689_s12 = sphi %s728_s12, %s891_s12  }
   0x5   : > { %s753_s18 = sadd.s32 1, %s701_s15   ;;  %s92_s19 = sadd.s32 1, %s697_s14 }
   0x6   : > { %s89_s20 = ssub.s32 %s701_s15, %s753_s18  ;;  %p102_p0 = scmp.ne.s32.totalorder %s697_s14, %s693_s13 }
   0x7   : > { %p90_p1 = scmp.eq.s32.totalorder %s89_s20, 0  ;;  %p103_p2 = scmp.eq.s32.totalorder %s749_s16, 1 }
   0x8   : > { %p108_p3 = scmp.ne.s32.totalorder %s693_s13, %s689_s12  ;;  %p109_p4 = scmp.eq.s32.totalorder %s502_s17, 1 }
   0x9   : > { %s764_s21 = scalar_select %p90_p1, %s697_s14, %s92_s19  }
   0xa   : > { %p766_p5 = por %p103_p2, %p102_p0  ;;  %p770_p6 = por %p109_p4, %p108_p3 }
   0xb   : > { %p503_p7 = scmp.ge.s32.totalorder %s701_s15, 1  ;;  %p116_p8 = scmp.lt.s32.totalorder %s701_s15, 3 }
   0xc   : > { %p565_p9 = scmp.eq.s32.totalorder %s749_s16, 0  ;;  %s127_s26 = sshll.u32 %s886_s1, 4  ;;  %s128_s26 = int_to_ptr.hbm [resolvable:$true] %s127_s26 }
   0xd   : > { %p117_p10 = pnand %p503_p7, %p116_p8  ;;  %s703_s27 = smov [#allocation2]  }
   0xe   : > { %s129_s28 = sshll.u32 %s703_s27, 4  ;;  %s704_s29 = smov 256   ;;  %s130_s28 = int_to_ptr.vmem [resolvable:$true] %s129_s28 }
   0xf   : > { %p557_p11 = pneg %p117_p10  ;;  %s705_s30 = smov 16  }
  0x10   : > { %157 = sbr.rel (%p117_p10) target bundleno = 381 (0x17d), region = 32 }
  0x11   : > { %p558_p12 = pnand %p565_p9, %p557_p11 }
  0x13   : > { %560 = dma.hbm_to_vmem [thread:$0]  (!%p558_p12), %s128_s26, 2048, %s130_s28, [#allocation3], %s704_s29, %s704_s29, %s705_s30  }
  0x15   : > { %680 = dma.done.wait (%p565_p9), [#allocation3], 2048  }
  0x16   : > { %682 = vsyncadd (%p565_p9), [#allocation3], 4294965248  ;;  %s509_s4 = sshll.u32 %s749_s16, 2  ;;  %v207_v0 = vld [vmem:[#allocation2 + $0x70] sm:$0xff]  ;;  %v208_v1 = vld [vmem:[#allocation2 + $0x78] sm:$0xff]  ;;  %vm209_vm0 = vcmask 523264  }
  0x17   : > { %p183_p13 = scmp.lt.s32.totalorder %s509_s4, 7  ;;  %v205_v2 = vld [vmem:[#allocation2 + $0x60] sm:$0xff]  ;;  %230 = vmatpush.msra.mxu0 %v207_v0  ;;  %259 = vmatpush.msra.mxu1 %v208_v1  ;;  %v206_v3 = vld [vmem:[#allocation2 + $0x68] sm:$0xff]  ;;  %v203_v4 = vld [vmem:[#allocation2 + $0x50] sm:$0xff]  ;;  %vm288_vm1 = vcmask 261120   ;;  %s179_s7 = sand.u32 1, %s693_s13  }
  0x18   : > { %v204_v5 = vld [vmem:[#allocation2 + $0x58] sm:$0xff]  ;;  %v201_v6 = vld [vmem:[#allocation2 + $0x40] sm:$0xff]  ;;  %v202_v7 = vld [vmem:[#allocation2 + $0x48] sm:$0xff]  ;;  %s542_s10 = sshll.u32 %s749_s16, 7  ;;  %s412_s25 = scalar_lea.sflag [#allocation4], %s179_s7 }
  0x19   : > { %231 = vmatpush.msra.mxu0 %v205_v2  ;;  %260 = vmatpush.msra.mxu1 %v206_v3  ;;  %s896_s4 = smov (!%p183_p13, %s509_s4), 7  ;;  %v199_v8 = vld [vmem:[#allocation2 + $0x30] sm:$0xff]  ;;  %v200_v9 = vld [vmem:[#allocation2 + $0x38] sm:$0xff]  ;;  %v197_v10 = vld [vmem:[#allocation2 + $0x20] sm:$0xff]  ;;  %s424_s19 = scalar_lea.hbm %s888_s3, %s542_s10 }
  0x1a   : > { %s510_s5 = sshll.u32 %s896_s4, 3  ;;  %v198_v11 = vld [vmem:[#allocation2 + $0x28] sm:$0xff]  ;;  %v195_v12 = vld [vmem:[#allocation2 + $0x10] sm:$0xff]  ;;  %v196_v13 = vld [vmem:[#allocation2 + $0x18] sm:$0xff]  ;;  %s427_s24 = sshll.u32 %s424_s19, 4  ;;  %s428_s24 = int_to_ptr.hbm [resolvable:$true] %s427_s24 }
  0x1b   : > { %232 = vmatpush.msra.mxu0 %v203_v4  ;;  %261 = vmatpush.msra.mxu1 %v204_v5  ;;  %s186_s8 = scalar_lea.vmem %s885_s0, %s510_s5  ;;  %v193_v14 = vld [vmem:[#allocation2] sm:$0xff]  ;;  %v194_v15 = vld [vmem:[#allocation2 + $0x8] sm:$0xff]  ;;  %v282_v29 = vld [vmem:[%s887_s2 + $0x10] sm:$0xff]  ;;  %s649_s16 = sshra.s32 %s428_s24, 4  ;;  %s650_s16 = int_to_ptr.hbm [resolvable:$true] %s649_s16 }
  0x1c   : > { %v189_v16 = vld [vmem:[%s186_s8] sm:$0xff]  ;;  %v190_v17 = vld [vmem:[%s186_s8 + $0x8] sm:$0xff]  ;;  %v191_v18 = vld [vmem:[%s186_s8 + $0x10] sm:$0xff]  ;;  %s651_s26 = scalar_lea.hbm %s650_s16, 128  ;;  %s655_s29 = scalar_lea.hbm %s888_s3, 256 }
  0x1d   : > { %233 = vmatpush.msra.mxu0 %v201_v6  ;;  %262 = vmatpush.msra.mxu1 %v202_v7  ;;  %v192_v19 = vld [vmem:[%s186_s8 + $0x18] sm:$0xff]  ;;  %v281_v28 = vld [vmem:[%s887_s2 + $0x8] sm:$0xff]  ;;  %v280_v31 = vld [vmem:[%s887_s2] sm:$0xff]  ;;  %s508_s8 = sshll.u32 %s179_s7, 7  ;;  %p652_p0 = scmp.ne.s32.totalorder %s650_s16, %s651_s26 }
  0x1e   : > { %v283_v30 = vld [vmem:[%s887_s2 + $0x18] sm:$0xff]  ;;  %v284_v32 = vld [vmem:[%s887_s2 + $0x20] sm:$0xff]  ;;  %v285_v33 = vld [vmem:[%s887_s2 + $0x28] sm:$0xff]  ;;  %s833_s9 = scalar_lea.vmem [#allocation5], %s508_s8  ;;  %p656_p3 = scmp.lt.s32.totalorder %s650_s16, %s888_s3 }
  0x1f   : > { %234 = vmatpush.msra.mxu0 %v199_v8  ;;  %263 = vmatpush.msra.mxu1 %v200_v9  ;;  %v286_v34 = vld [vmem:[%s887_s2 + $0x30] sm:$0xff]  ;;  %v287_v35 = vld [vmem:[%s887_s2 + $0x38] sm:$0xff]  ;;  %s425_s20 = sshll.u32 %s833_s9, 4  ;;  %p653_p1 = pnand %p652_p0, %p766_p5  ;;  %s426_s20 = int_to_ptr.vmem [resolvable:$true] %s425_s20 }
  0x20   : > { %p657_p4 = scmp.lt.s32.totalorder %s655_s29, %s651_s26 }
  0x21   : > { %235 = vmatpush.msra.mxu0 %v197_v10  ;;  %264 = vmatpush.msra.mxu1 %v198_v11  ;;  %p654_p2 = pneg %p653_p1 }
  0x22   : > { %p658_p7 = por %p657_p4, %p656_p3 }
  0x23   : > { %236 = vmatpush.msra.mxu0 %v195_v12  ;;  %265 = vmatpush.msra.mxu1 %v196_v13 }
  0x24   : > { %p659_p8 = pnand %p658_p7, %p654_p2 }
  0x25   : > { %237 = vmatpush.msra.mxu0 %v193_v14  ;;  %266 = vmatpush.msra.mxu1 %v194_v15 }
  0x26   : > { %511 = vmatmul.msk.f32.vlgmr.msra.gmra.mxu0 %vm209_vm0, %v189_v16  ;;  %515 = vmatmul.msk.f32.vlgmr.msra.gmra.mxu1 %vm209_vm0, %v189_v16 }
  0x2e   : > { %512 = vmatmul.msk.f32.gmra.mxu0 %vm209_vm0, %v190_v17  ;;  %516 = vmatmul.msk.f32.gmra.mxu1 %vm209_vm0, %v190_v17 }
  0x36   : > { %513 = vmatmul.msk.f32.gmra.mxu0 %vm209_vm0, %v191_v18  ;;  %517 = vmatmul.msk.f32.gmra.mxu1 %vm209_vm0, %v191_v18 }
  0x3e   : > { %514 = vmatmul.msk.f32.gmra.mxu0 %vm209_vm0, %v192_v19  ;;  %518 = vmatmul.msk.f32.gmra.mxu1 %vm209_vm0, %v192_v19 }
  0xa3   : > { %v239_v20 = vpop.f32.mrf.mxu0  ;;  %v268_v21 = vpop.f32.mrf.mxu1 }
  0xab   : > { %v242_v22 = vpop.f32.mrf.mxu0  ;;  %v271_v23 = vpop.f32.mrf.mxu1 }
  0xb3   : > { %v245_v24 = vpop.f32.mrf.mxu0  ;;  %v274_v25 = vpop.f32.mrf.mxu1 }
  0xbb   : > { %v248_v26 = vpop.f32.mrf.mxu0  ;;  %v277_v27 = vpop.f32.mrf.mxu1 }
  0xbc   : > { %325 = vmatpush.msrb.mxu0 %v248_v26  ;;  %543 = vmatpush.msra.mxu2 %v248_v26 }
  0xbd   : > { %366 = vmatpush.msrb.mxu1 %v277_v27  ;;  %547 = vmatpush.msra.mxu3 %v277_v27 }
  0xbe   : > { %326 = vmatpush.msrb.mxu0 %v245_v24  ;;  %544 = vmatpush.msra.mxu2 %v245_v24 }
  0xbf   : > { %367 = vmatpush.msrb.mxu1 %v274_v25  ;;  %548 = vmatpush.msra.mxu3 %v274_v25 }
  0xc0   : > { %327 = vmatpush.msrb.mxu0 %v242_v22  ;;  %545 = vmatpush.msra.mxu2 %v242_v22 }
  0xc1   : > { %368 = vmatpush.msrb.mxu1 %v271_v23  ;;  %549 = vmatpush.msra.mxu3 %v271_v23 }
  0xc2   : > { %328 = vmatpush.msrb.mxu0 %v239_v20  ;;  %546 = vmatpush.msra.mxu2 %v239_v20 }
  0xc3   : > { %369 = vmatpush.msrb.mxu1 %v268_v21  ;;  %550 = vmatpush.msra.mxu3 %v268_v21 }
  0xc4   : > { %520 = vmatmul.msk.f32.vlgmr.msra.gmra.mxu2 %vm288_vm1, %v281_v28  ;;  %528 = vmatmul.msk.f32.vlgmr.msra.gmra.mxu3 %vm288_vm1, %v281_v28 }
  0xc5   : > { %519 = vmatmul.msk.f32.vlgmr.msrb.gmra.mxu0 %vm288_vm1, %v280_v31  ;;  %527 = vmatmul.msk.f32.vlgmr.msrb.gmra.mxu1 %vm288_vm1, %v280_v31 }
  0xcc   : > { %521 = vmatmul.msk.f32.gmra.mxu2 %vm288_vm1, %v282_v29  ;;  %529 = vmatmul.msk.f32.gmra.mxu3 %vm288_vm1, %v282_v29 }
  0xd4   : > { %522 = vmatmul.msk.f32.gmra.mxu2 %vm288_vm1, %v283_v30  ;;  %530 = vmatmul.msk.f32.gmra.mxu3 %vm288_vm1, %v283_v30 }
  0xdc   : > { %523 = vmatmul.msk.f32.gmra.mxu2 %vm288_vm1, %v284_v32  ;;  %531 = vmatmul.msk.f32.gmra.mxu3 %vm288_vm1, %v284_v32 }
  0xe4   : > { %524 = vmatmul.msk.f32.gmra.mxu2 %vm288_vm1, %v285_v33  ;;  %532 = vmatmul.msk.f32.gmra.mxu3 %vm288_vm1, %v285_v33 }
  0xec   : > { %525 = vmatmul.msk.f32.gmra.mxu2 %vm288_vm1, %v286_v34  ;;  %533 = vmatmul.msk.f32.gmra.mxu3 %vm288_vm1, %v286_v34 }
  0xf4   : > { %526 = vmatmul.msk.f32.gmra.mxu2 %vm288_vm1, %v287_v35  ;;  %534 = vmatmul.msk.f32.gmra.mxu3 %vm288_vm1, %v287_v35 }
 0x142   : > { %v330_v40 = vpop.f32.mrf.mxu0  ;;  %v371_v43 = vpop.f32.mrf.mxu1 }
 0x143   : > { %395 = vst [vmem:[%s833_s9] sm:$0xff] %v330_v40 }
 0x144   : > { %396 = vst [vmem:[%s833_s9 + $0x8] sm:$0xff] %v371_v43 }
 0x147   : > { %v333_v36 = vpop.f32.mrf.mxu2  ;;  %v374_v37 = vpop.f32.mrf.mxu3 }
 0x148   : > { %397 = vst [vmem:[%s833_s9 + $0x10] sm:$0xff] %v333_v36 }
 0x149   : > { %398 = vst [vmem:[%s833_s9 + $0x18] sm:$0xff] %v374_v37 }
 0x14f   : > { %v336_v38 = vpop.f32.mrf.mxu2  ;;  %v377_v39 = vpop.f32.mrf.mxu3 }
 0x150   : > { %399 = vst [vmem:[%s833_s9 + $0x20] sm:$0xff] %v336_v38 }
 0x151   : > { %400 = vst [vmem:[%s833_s9 + $0x28] sm:$0xff] %v377_v39 }
 0x157   : > { %v339_v41 = vpop.f32.mrf.mxu2  ;;  %v380_v42 = vpop.f32.mrf.mxu3 }
 0x158   : > { %401 = vst [vmem:[%s833_s9 + $0x30] sm:$0xff] %v339_v41 }
 0x159   : > { %402 = vst [vmem:[%s833_s9 + $0x38] sm:$0xff] %v380_v42 }
 0x15f   : > { %v342_v44 = vpop.f32.mrf.mxu2  ;;  %v383_v45 = vpop.f32.mrf.mxu3 }
 0x160   : > { %403 = vst [vmem:[%s833_s9 + $0x40] sm:$0xff] %v342_v44 }
 0x161   : > { %404 = vst [vmem:[%s833_s9 + $0x48] sm:$0xff] %v383_v45 }
 0x167   : > { %v345_v46 = vpop.f32.mrf.mxu2  ;;  %v386_v47 = vpop.f32.mrf.mxu3 }
 0x168   : > { %405 = vst [vmem:[%s833_s9 + $0x50] sm:$0xff] %v345_v46 }
 0x169   : > { %406 = vst [vmem:[%s833_s9 + $0x58] sm:$0xff] %v386_v47 }
 0x16f   : > { %v348_v48 = vpop.f32.mrf.mxu2  ;;  %v389_v49 = vpop.f32.mrf.mxu3 }
 0x170   : > { %407 = vst [vmem:[%s833_s9 + $0x60] sm:$0xff] %v348_v48 }
 0x171   : > { %408 = vst [vmem:[%s833_s9 + $0x68] sm:$0xff] %v389_v49 }
 0x177   : > { %v351_v50 = vpop.f32.mrf.mxu2  ;;  %v392_v51 = vpop.f32.mrf.mxu3 }
 0x178   : > { %409 = vst [vmem:[%s833_s9 + $0x70] sm:$0xff] %v351_v50 }
 0x179   : > { %410 = vst [vmem:[%s833_s9 + $0x78] sm:$0xff] %v392_v51 }
 0x17a   : > { %662 = shalt.err (!%p659_p8)
}
 0x17b   : > { %s706_s5 = smov 256   ;;  %s707_s6 = smov 16  }
 0x17c   : > { %555 = dma.vmem_to_hbm [thread:$0]  (%p766_p5), %s426_s20, 2048, %s428_s24, %s412_s25, %s706_s5, %s706_s5, %s707_s6  }
 0x17d PF: > { %p567_p9 = scmp.ge.s32.totalorder %s701_s15, 2  ;;  %s442_s7 = sand.u32 1, %s689_s12  }
 0x17e   : > { %s443_s8 = scalar_lea.sflag [#allocation4], %s442_s7 }
 0x17f   : > { %p562_p10 = pnand %p567_p9, %p770_p6 }
 0x181   : > { %p563_p11 = pneg %p562_p10 }
 0x183   : > { %684 = dma.done.wait (%p563_p11), %s443_s8, 2048  }
 0x184   : > { %686 = vsyncadd (%p563_p11), %s443_s8, 4294965248  ;;  %p14_p12 = scmp.ge.s32.totalorder %s753_s18, 4   ;;  %s891_s12 = smov %s693_s13 }
 0x185   : > { %s892_s13 = smov %s697_s14  ;;  %s893_s14 = smov %s764_s21 }
 0x186   : > { %s894_s15 = smov %s753_s18  ;;  %16 = sbr.rel (!%p14_p12) target bundleno = 4 (0x4), region = 72 }
 0x18b   :  { %449 = vsyncpa [#allocation3], 1 }
 0x18c   :  { %451 = vsyncpa [#allocation3 + $0x1], 1 }
 0x18d   :  { %452 = vsyncpa [#allocation4], 1 }
 0x18e   :  { %454 = vsyncpa [#allocation4 + $0x1], 1 }

</bundles_post_ra>
